<compile_context>
chip_gen: v7x
topology: tpu7x:2x2x1
jax: 0.10.0
libtpu: 0.0.40
codegen_flags: <defaults>
</compile_context>

<pallas_src>
import functools

import jax
import jax.numpy as jnp
from jax.experimental import pallas as pl
from jax.experimental.pallas import tpu as pltpu


# ----------------------------- Pallas kernels -----------------------------

def _qkv_kernel(x_ref, wq_ref, wk_ref, wv_ref, bq_ref, bk_ref, bv_ref,
                q_ref, k_ref, v_ref, *, scale):
    # Q/K/V = x @ W{q,k,v} + b{q,k,v}; the softmax scale is folded into the Q epilogue.
    # x tile loaded once, reused by all three MXU dots; operands in the weight dtype
    # (bf16 by default) with f32 accumulation; outputs written lane-dense (tn columns).
    x = x_ref[...].astype(wq_ref.dtype)
    q = jnp.dot(x, wq_ref[...], preferred_element_type=jnp.float32) + bq_ref[...]
    q_ref[...] = (q * scale).astype(q_ref.dtype)          # scale folded here (VALU slack)
    k = jnp.dot(x, wk_ref[...], preferred_element_type=jnp.float32) + bk_ref[...]
    k_ref[...] = k.astype(k_ref.dtype)
    v = jnp.dot(x, wv_ref[...], preferred_element_type=jnp.float32) + bv_ref[...]
    v_ref[...] = v.astype(v_ref.dtype)


def _flash_attn_kernel(q_ref, k_ref, v_ref, o_ref, m_ref, l_ref, acc_ref):
    # Online-softmax attention for one (batch*head, q-tile); grid axis 2 walks KV tiles.
    # Only a [tq, tk] f32 score tile is ever materialized; m/l/acc persist in VMEM scratch.
    ki = pl.program_id(2)

    @pl.when(ki == 0)
    def _init():
        m_ref[...] = jnp.full(m_ref.shape, -jnp.inf, jnp.float32)
        l_ref[...] = jnp.zeros(l_ref.shape, jnp.float32)
        acc_ref[...] = jnp.zeros(acc_ref.shape, jnp.float32)

    # s = q @ k^T, contracting the head dim directly (no transposed copy of k).
    s = jax.lax.dot_general(q_ref[...], k_ref[...],
                            dimension_numbers=(((1,), (1,)), ((), ())),
                            preferred_element_type=jnp.float32)        # [tq, tk] f32
    m_prev = m_ref[...]
    m_new = jnp.maximum(m_prev, jnp.max(s, axis=-1, keepdims=True))
    alpha = jnp.exp(m_prev - m_new)                                    # rescale old stats
    p = jnp.exp(s - m_new)                                             # f32 elementwise (v5e-safe)
    l_ref[...] = alpha * l_ref[...] + jnp.sum(p, axis=-1, keepdims=True)
    acc_ref[...] = alpha * acc_ref[...] + jax.lax.dot_general(
        p.astype(v_ref.dtype), v_ref[...],
        dimension_numbers=(((1,), (0,)), ((), ())),
        preferred_element_type=jnp.float32)
    m_ref[...] = m_new

    @pl.when(ki == pl.num_programs(2) - 1)
    def _finalize():
        inv = pl.reciprocal(l_ref[...], approx=True)                   # EUP slot
        o_ref[...] = (acc_ref[...] * inv).astype(o_ref.dtype)


def _out_kernel(ctx_ref, w_ref, b_ref, x_ref, g_ref, beta_ref, o_ref, *, eps):
    # out = LayerNorm( (ctx @ Wo + bo) + x )   (dropout p=0.0 -> identity)
    y = jnp.dot(ctx_ref[...].astype(w_ref.dtype), w_ref[...],
                preferred_element_type=jnp.float32)
    y = y + b_ref[...] + x_ref[...].astype(jnp.float32)
    mu = jnp.mean(y, axis=-1, keepdims=True)
    d = y - mu
    var = jnp.mean(d * d, axis=-1, keepdims=True)      # two-pass variance: no cancellation
    yn = d * jax.lax.rsqrt(var + eps)
    o_ref[...] = (yn * g_ref[...] + beta_ref[...]).astype(o_ref.dtype)


# ----------------------------- sizing helpers -----------------------------

_MIB = 1024 * 1024


def _vmem_budget():
    # Scoped-VMEM request: physical capacity minus headroom for Mosaic internal scratch,
    # semaphores and double-buffers (v7x: 64 MiB -> ~48 MiB; v5e/v6e: 128 MiB -> ~112 MiB).
    cap = 64 * _MIB
    try:
        cap = int(getattr(pltpu.get_tpu_info(), "vmem_capacity_bytes", cap))
    except Exception:
        pass
    return max(32 * _MIB, cap - 16 * _MIB)


def _choose_row_tile(M, per_row_bytes, resident_bytes, budget, max_tm=512):
    # Biggest row tile (<=512 rows, multiple of 8) whose double-buffered tiles plus the
    # resident weights stay inside roughly half the scoped-VMEM budget.
    if M <= max_tm:
        return M
    avail = max(budget // 2 - resident_bytes, 8 * per_row_bytes)
    tm = int(min(max_tm, avail // max(per_row_bytes, 1), M))
    return max(8, (tm // 8) * 8)


def _choose_col_tile(N, prefs=(512, 256)):
    # Column tile so only a (K, tn) slice of each weight is resident per step as D grows.
    for t in prefs:
        if N > t and N % t == 0:
            return t
    return N


def _choose_seq_tile(L, prefs=(256, 128)):
    for t in prefs:
        if L % t == 0:
            return t
    return L


# ----------------------------- pallas_call wrappers -----------------------------

def _pallas_qkv(x2d, wq, wk, wv, bq, bk, bv, *, scale, out_dtype, budget):
    M, K = x2d.shape
    N = wq.shape[1]
    tn = _choose_col_tile(N)
    wb = jnp.dtype(wq.dtype).itemsize
    xb = jnp.dtype(x2d.dtype).itemsize
    ob = jnp.dtype(out_dtype).itemsize
    resident = 2 * 3 * (K * tn + tn) * wb            # double-buffered weight/bias column tiles
    per_row = 2 * K * xb + 2 * 3 * tn * ob           # double-buffered x tile + 3 output tiles
    tm = _choose_row_tile(M, per_row, resident, budget)

    row_x = pl.BlockSpec((tm, K), lambda i, j: (i, 0))      # resident across column steps
    wspec = pl.BlockSpec((K, tn), lambda i, j: (0, j))
    bspec = pl.BlockSpec((1, tn), lambda i, j: (0, j))
    ospec = pl.BlockSpec((tm, tn), lambda i, j: (i, j))
    kern = functools.partial(_qkv_kernel, scale=scale)
    return pl.pallas_call(
        kern,
        out_shape=tuple(jax.ShapeDtypeStruct((M, N), out_dtype) for _ in range(3)),
        grid=(pl.cdiv(M, tm), pl.cdiv(N, tn)),
        in_specs=[row_x, wspec, wspec, wspec, bspec, bspec, bspec],
        out_specs=(ospec, ospec, ospec),
        compiler_params=pltpu.CompilerParams(
            dimension_semantics=("parallel", "parallel"),
            vmem_limit_bytes=budget),
    )(x2d, wq, wk, wv, bq.reshape(1, N), bk.reshape(1, N), bv.reshape(1, N))


def _pallas_flash_attention(qh, kh, vh, *, budget):
    # qh/kh/vh: [B*H, L, Dh]  (contiguous regroup == PyTorch .view semantics).
    BH, L, Dh = qh.shape
    Lk = kh.shape[1]
    tq = _choose_seq_tile(L)
    tk = _choose_seq_tile(Lk)
    grid = (BH, L // tq, Lk // tk)

    qspec = pl.BlockSpec((None, tq, Dh), lambda b, qi, ki: (b, qi, 0))   # resident over ki
    kspec = pl.BlockSpec((None, tk, Dh), lambda b, qi, ki: (b, ki, 0))
    vspec = pl.BlockSpec((None, tk, Dh), lambda b, qi, ki: (b, ki, 0))
    ospec = pl.BlockSpec((None, tq, Dh), lambda b, qi, ki: (b, qi, 0))   # revisited over ki
    return pl.pallas_call(
        _flash_attn_kernel,
        out_shape=jax.ShapeDtypeStruct((BH, L, Dh), qh.dtype),
        grid=grid,
        in_specs=[qspec, kspec, vspec],
        out_specs=ospec,
        scratch_shapes=[pltpu.VMEM((tq, 1), jnp.float32),    # running max m
                        pltpu.VMEM((tq, 1), jnp.float32),    # running normalizer l
                        pltpu.VMEM((tq, Dh), jnp.float32)],  # context accumulator
        compiler_params=pltpu.CompilerParams(
            dimension_semantics=("parallel", "parallel", "arbitrary"),
            vmem_limit_bytes=budget),
    )(qh, kh, vh)


def _pallas_out_proj_ln(ctx2d, wo, bo, x2d, ln_w, ln_b, *, budget, eps=1e-5):
    M, D = x2d.shape
    wb = jnp.dtype(wo.dtype).itemsize
    cb = jnp.dtype(ctx2d.dtype).itemsize
    resident = 2 * (D * D + D) * wb + 2 * 2 * D * 4           # Wo/bo + gamma/beta buffers
    per_row = 2 * D * cb + 2 * D * 4 + 2 * D * 4              # ctx + residual x + out, 2-buffered
    tm = _choose_row_tile(M, per_row, resident, budget)
    kern = functools.partial(_out_kernel, eps=eps)
    row = lambda i: (i, 0)
    rep = lambda i: (0, 0)
    return pl.pallas_call(
        kern,
        out_shape=jax.ShapeDtypeStruct((M, D), x2d.dtype),
        grid=(pl.cdiv(M, tm),),
        in_specs=[
            pl.BlockSpec((tm, D), row),        # context tile (bf16)
            pl.BlockSpec((D, D), rep),         # Wo resident
            pl.BlockSpec((1, D), rep),         # bo
            pl.BlockSpec((tm, D), row),        # residual x tile (f32)
            pl.BlockSpec((1, D), rep),         # gamma
            pl.BlockSpec((1, D), rep),         # beta
        ],
        out_specs=pl.BlockSpec((tm, D), row),  # lane-dense [tm, D] output block
        compiler_params=pltpu.CompilerParams(
            dimension_semantics=("parallel",),
            vmem_limit_bytes=budget),
    )(ctx2d, wo, bo.reshape(1, D), x2d, ln_w.reshape(1, D), ln_b.reshape(1, D))


def multi_head_attention(x, params, num_head, *, compute_dtype=jnp.bfloat16, eps=1e-5):
    """Forward of Multi_Head_Attention.  x: [B, L, D]."""
    B, L, D = x.shape
    dim_head = D // num_head
    M = B * L
    x2d = x.reshape(M, D)
    budget = _vmem_budget()
    cd = jnp.dtype(compute_dtype)

    # bf16 MXU operands (f32 accumulation): weights cast once here; activations in-kernel.
    wq = params["Wq"].astype(cd)
    wk = params["Wk"].astype(cd)
    wv = params["Wv"].astype(cd)
    wo = params["Wo"].astype(cd)

    scale = float(dim_head) ** (-0.5)

    # 1) Fused Q/K/V projection (softmax scale folded into Q); Q/K/V in HBM as bf16.
    Q, K, V = _pallas_qkv(x2d, wq, wk, wv, params["bq"], params["bk"], params["bv"],
                          scale=scale, out_dtype=cd, budget=budget)

    # Exact PyTorch `.view(B*num_head, -1, dim_head)` semantics: a contiguous
    # (metadata-only) regroup of the flat element order — no transpose.
    Qh = Q.reshape(B * num_head, -1, dim_head)
    Kh = K.reshape(B * num_head, -1, dim_head)
    Vh = V.reshape(B * num_head, -1, dim_head)

    # 2) Flash attention over (B*H, q-tiles, kv-tiles).
    ctx = _pallas_flash_attention(Qh, Kh, Vh, budget=budget)

    # `.view(B, -1, num_head * dim_head)`: again a pure contiguous regroup.
    ctx2d = ctx.reshape(M, D)

    # 3) fc + dropout(p=0) + residual + LayerNorm (fused, row-tiled, lane-dense [tm, D] out).
    out2d = _pallas_out_proj_ln(ctx2d, wo, params["bo"], x2d,
                                params["ln_w"], params["ln_b"], budget=budget, eps=eps)
    return out2d.reshape(B, L, D)


# ----------------------------- reference (pure JAX, f32) -----------------------------

def _reference(x, params, num_head):
    B, L, D = x.shape
    dh = D // num_head
    x2d = x.reshape(B * L, D)
    Q = (x2d @ params["Wq"] + params["bq"]).reshape(B * num_head, -1, dh)
    K = (x2d @ params["Wk"] + params["bk"]).reshape(B * num_head, -1, dh)
    V = (x2d @ params["Wv"] + params["bv"]).reshape(B * num_head, -1, dh)
    s = jnp.einsum("bqd,bkd->bqk", Q, K) * (dh ** -0.5)
    p = jax.nn.softmax(s, axis=-1)
    ctx = jnp.einsum("bqk,bkd->bqd", p, V).reshape(B * L, D)
    y = ctx @ params["Wo"] + params["bo"] + x2d
    mu = y.mean(-1, keepdims=True)
    var = ((y - mu) ** 2).mean(-1, keepdims=True)
    y = (y - mu) / jnp.sqrt(var + 1e-5) * params["ln_w"] + params["ln_b"]
    return y.reshape(B, L, D)


# ----------------------------- main -----------------------------

if __name__ == "__main__":
    # Small shapes for the correctness check (real perf measurement needs L>=512, D>=512).
    B, L, D, H = 2, 8, 32, 4   # batch, seq, dim_model, num_head

    key = jax.random.PRNGKey(0)
    ks = jax.random.split(key, 9)
    init = lambda k, shape, s: (s * jax.random.normal(k, shape, dtype=jnp.float32))

    params = {
        "Wq": init(ks[0], (D, D), 0.05), "bq": init(ks[1], (D,), 0.05),
        "Wk": init(ks[2], (D, D), 0.05), "bk": init(ks[3], (D,), 0.05),
        "Wv": init(ks[4], (D, D), 0.05), "bv": init(ks[5], (D,), 0.05),
        "Wo": init(ks[6], (D, D), 0.05), "bo": init(ks[7], (D,), 0.05),
        "ln_w": jnp.ones((D,), jnp.float32),   # nn.LayerNorm default init
        "ln_b": jnp.zeros((D,), jnp.float32),
    }

    x = jax.random.normal(ks[8], (B, L, D), dtype=jnp.float32)

    out = multi_head_attention(x, params, num_head=H)
    out = jax.block_until_ready(out)

    ref = _reference(x, params, num_head=H)
    assert out.shape == (B, L, D)
    # bf16 MXU operands (f32 accumulation) + approx reciprocal: ~1e-3-level deviations
    # from the pure-f32 reference are expected; tolerance re-validated accordingly.
    assert jnp.allclose(out, ref, atol=5e-3, rtol=5e-3), "mismatch vs pure-JAX reference"

    print("KERNEL_OK")
</pallas_src>

<mosaic_0001>
module attributes {stable_mosaic.version = 11 : i64} {
  func.func @_qkv_kernel(%arg0: i32, %arg1: i32, %arg2: memref<16x32xf32, #tpu.memory_space<vmem>>, %arg3: memref<32x32xbf16, #tpu.memory_space<vmem>>, %arg4: memref<32x32xbf16, #tpu.memory_space<vmem>>, %arg5: memref<32x32xbf16, #tpu.memory_space<vmem>>, %arg6: memref<1x32xf32, #tpu.memory_space<vmem>>, %arg7: memref<1x32xf32, #tpu.memory_space<vmem>>, %arg8: memref<1x32xf32, #tpu.memory_space<vmem>>, %arg9: memref<16x32xbf16, #tpu.memory_space<vmem>>, %arg10: memref<16x32xbf16, #tpu.memory_space<vmem>>, %arg11: memref<16x32xbf16, #tpu.memory_space<vmem>>) attributes {dimension_semantics = [#tpu.dimension_semantics<parallel>, #tpu.dimension_semantics<parallel>], iteration_bounds = array<i64: 1, 1>, scalar_prefetch = 0 : i64, scratch_operands = 0 : i64, tpu.core_type = #tpu.core_type<tc>, window_params = [{transform_indices = @transform_0, window_bounds = array<i64: 16, 32>}, {transform_indices = @transform_1, window_bounds = array<i64: 32, 32>}, {transform_indices = @transform_2, window_bounds = array<i64: 32, 32>}, {transform_indices = @transform_3, window_bounds = array<i64: 32, 32>}, {transform_indices = @transform_4, window_bounds = array<i64: 1, 32>}, {transform_indices = @transform_5, window_bounds = array<i64: 1, 32>}, {transform_indices = @transform_6, window_bounds = array<i64: 1, 32>}, {transform_indices = @transform_7, window_bounds = array<i64: 16, 32>}, {transform_indices = @transform_8, window_bounds = array<i64: 16, 32>}, {transform_indices = @transform_9, window_bounds = array<i64: 16, 32>}]} {
    %c0 = arith.constant 0 : index
    %c0_0 = arith.constant 0 : index
    %0 = vector.load %arg2[%c0, %c0_0] : memref<16x32xf32, #tpu.memory_space<vmem>>, vector<16x32xf32>
    %1 = arith.truncf %0 : vector<16x32xf32> to vector<16x32xbf16>
    %c0_1 = arith.constant 0 : index
    %c0_2 = arith.constant 0 : index
    %2 = vector.load %arg3[%c0_1, %c0_2] : memref<32x32xbf16, #tpu.memory_space<vmem>>, vector<32x32xbf16>
    %cst = arith.constant dense<0.000000e+00> : vector<16x32xf32>
    %3 = tpu.matmul %1, %2, %cst {dimension_numbers = #tpu.dot_dimension_numbers<[1], [0], [0], [1], [0, 0, 1, 1], [], []>} : vector<16x32xbf16>, vector<32x32xbf16>, vector<16x32xf32> -> vector<16x32xf32>
    %c0_3 = arith.constant 0 : index
    %c0_4 = arith.constant 0 : index
    %4 = vector.load %arg6[%c0_3, %c0_4] : memref<1x32xf32, #tpu.memory_space<vmem>>, vector<1x32xf32>
    %5 = vector.broadcast %4 : vector<1x32xf32> to vector<16x32xf32>
    %6 = arith.addf %3, %5 : vector<16x32xf32>
    %cst_5 = arith.constant 0.353553385 : f32
    %7 = vector.broadcast %cst_5 : f32 to vector<16x32xf32>
    %8 = arith.mulf %6, %7 : vector<16x32xf32>
    %9 = arith.truncf %8 : vector<16x32xf32> to vector<16x32xbf16>
    %c0_6 = arith.constant 0 : index
    %c0_7 = arith.constant 0 : index
    %10 = vector.load %arg9[%c0_6, %c0_7] : memref<16x32xbf16, #tpu.memory_space<vmem>>, vector<16x32xbf16>
    tpu.vector_store %arg9[%c0_6, %c0_7], %9 {strides = array<i32>} : memref<16x32xbf16, #tpu.memory_space<vmem>>, vector<16x32xbf16>,
    %c0_8 = arith.constant 0 : index
    %c0_9 = arith.constant 0 : index
    %11 = vector.load %arg4[%c0_8, %c0_9] : memref<32x32xbf16, #tpu.memory_space<vmem>>, vector<32x32xbf16>
    %cst_10 = arith.constant dense<0.000000e+00> : vector<16x32xf32>
    %12 = tpu.matmul %1, %11, %cst_10 {dimension_numbers = #tpu.dot_dimension_numbers<[1], [0], [0], [1], [0, 0, 1, 1], [], []>} : vector<16x32xbf16>, vector<32x32xbf16>, vector<16x32xf32> -> vector<16x32xf32>
    %c0_11 = arith.constant 0 : index
    %c0_12 = arith.constant 0 : index
    %13 = vector.load %arg7[%c0_11, %c0_12] : memref<1x32xf32, #tpu.memory_space<vmem>>, vector<1x32xf32>
    %14 = vector.broadcast %13 : vector<1x32xf32> to vector<16x32xf32>
    %15 = arith.addf %12, %14 : vector<16x32xf32>
    %16 = arith.truncf %15 : vector<16x32xf32> to vector<16x32xbf16>
    %c0_13 = arith.constant 0 : index
    %c0_14 = arith.constant 0 : index
    %17 = vector.load %arg10[%c0_13, %c0_14] : memref<16x32xbf16, #tpu.memory_space<vmem>>, vector<16x32xbf16>
    tpu.vector_store %arg10[%c0_13, %c0_14], %16 {strides = array<i32>} : memref<16x32xbf16, #tpu.memory_space<vmem>>, vector<16x32xbf16>,
    %c0_15 = arith.constant 0 : index
    %c0_16 = arith.constant 0 : index
    %18 = vector.load %arg5[%c0_15, %c0_16] : memref<32x32xbf16, #tpu.memory_space<vmem>>, vector<32x32xbf16>
    %cst_17 = arith.constant dense<0.000000e+00> : vector<16x32xf32>
    %19 = tpu.matmul %1, %18, %cst_17 {dimension_numbers = #tpu.dot_dimension_numbers<[1], [0], [0], [1], [0, 0, 1, 1], [], []>} : vector<16x32xbf16>, vector<32x32xbf16>, vector<16x32xf32> -> vector<16x32xf32>
    %c0_18 = arith.constant 0 : index
    %c0_19 = arith.constant 0 : index
    %20 = vector.load %arg8[%c0_18, %c0_19] : memref<1x32xf32, #tpu.memory_space<vmem>>, vector<1x32xf32>
    %21 = vector.broadcast %20 : vector<1x32xf32> to vector<16x32xf32>
    %22 = arith.addf %19, %21 : vector<16x32xf32>
    %23 = arith.truncf %22 : vector<16x32xf32> to vector<16x32xbf16>
    %c0_20 = arith.constant 0 : index
    %c0_21 = arith.constant 0 : index
    %24 = vector.load %arg11[%c0_20, %c0_21] : memref<16x32xbf16, #tpu.memory_space<vmem>>, vector<16x32xbf16>
    tpu.vector_store %arg11[%c0_20, %c0_21], %23 {strides = array<i32>} : memref<16x32xbf16, #tpu.memory_space<vmem>>, vector<16x32xbf16>,
    return
  }
  func.func @transform_0(%arg0: i32, %arg1: i32) -> (i32, i32) {
    %c0_i32 = arith.constant 0 : i32
    %c0_i32_0 = arith.constant 0 : i32
    return %arg0, %c0_i32 : i32, i32
  }
  func.func @transform_1(%arg0: i32, %arg1: i32) -> (i32, i32) {
    %c0_i32 = arith.constant 0 : i32
    %c0_i32_0 = arith.constant 0 : i32
    return %c0_i32, %arg1 : i32, i32
  }
  func.func @transform_2(%arg0: i32, %arg1: i32) -> (i32, i32) {
    %c0_i32 = arith.constant 0 : i32
    %c0_i32_0 = arith.constant 0 : i32
    return %c0_i32, %arg1 : i32, i32
  }
  func.func @transform_3(%arg0: i32, %arg1: i32) -> (i32, i32) {
    %c0_i32 = arith.constant 0 : i32
    %c0_i32_0 = arith.constant 0 : i32
    return %c0_i32, %arg1 : i32, i32
  }
  func.func @transform_4(%arg0: i32, %arg1: i32) -> (i32, i32) {
    %c0_i32 = arith.constant 0 : i32
    %c0_i32_0 = arith.constant 0 : i32
    return %c0_i32, %arg1 : i32, i32
  }
  func.func @transform_5(%arg0: i32, %arg1: i32) -> (i32, i32) {
    %c0_i32 = arith.constant 0 : i32
    %c0_i32_0 = arith.constant 0 : i32
    return %c0_i32, %arg1 : i32, i32
  }
  func.func @transform_6(%arg0: i32, %arg1: i32) -> (i32, i32) {
    %c0_i32 = arith.constant 0 : i32
    %c0_i32_0 = arith.constant 0 : i32
    return %c0_i32, %arg1 : i32, i32
  }
  func.func @transform_7(%arg0: i32, %arg1: i32) -> (i32, i32) {
    %c0_i32 = arith.constant 0 : i32
    return %arg0, %arg1 : i32, i32
  }
  func.func @transform_8(%arg0: i32, %arg1: i32) -> (i32, i32) {
    %c0_i32 = arith.constant 0 : i32
    return %arg0, %arg1 : i32, i32
  }
  func.func @transform_9(%arg0: i32, %arg1: i32) -> (i32, i32) {
    %c0_i32 = arith.constant 0 : i32
    return %arg0, %arg1 : i32, i32
  }
}

</mosaic_0001>

<bundles_post_ra>
// kernel: tpu_custom_call.1
= control target key start
LH: loop header
LB: loop body
LE: loop exit
PB: predicated region body
PF: predicated region fallthrough
CT: control target
= control target key end

     0   :  { %15 = vsyncpa [#allocation3], 0  ;;  %s809_s0 = inlined_call_operand.hbm [shape: f32[16,32], index: 0, kind: input, shape index: {}]   ;;  %s810_s1 = inlined_call_operand.hbm [shape: bf16[32,32], index: 1, kind: input, shape index: {}]   ;;  %s811_s2 = inlined_call_operand.hbm [shape: bf16[32,32], index: 2, kind: input, shape index: {}]   ;;  %s812_s3 = inlined_call_operand.hbm [shape: bf16[32,32], index: 3, kind: input, shape index: {}]   ;;  %s813_s4 = inlined_call_operand.vmem [shape: f32[1,32], index: 4, kind: input, shape index: {}]   ;;  %s814_s5 = inlined_call_operand.vmem [shape: f32[1,32], index: 5, kind: input, shape index: {}]   ;;  %s815_s6 = inlined_call_operand.vmem [shape: f32[1,32], index: 6, kind: input, shape index: {}]   ;;  %s816_s7 = inlined_call_operand.hbm [shape: bf16[16,32], index: 7, kind: output, shape index: {0}]   ;;  %s817_s8 = inlined_call_operand.hbm [shape: bf16[16,32], index: 8, kind: output, shape index: {1}]   ;;  %s818_s9 = inlined_call_operand.hbm [shape: bf16[16,32], index: 9, kind: output, shape index: {2}]  }
   0x1   :  { %16 = vsyncpa [#allocation6], 0 }
   0x2   :  { %17 = vsyncpa [#allocation9], 0 }
   0x3   :  { %18 = vsyncpa [#allocation4], 0 }
   0x4   :  { %19 = vsyncpa [#allocation12], 0  ;;  %s609_s30 = smov [#allocation5]   ;;  %s445_s13 = scalar_lea.hbm %s810_s1, 256 }
   0x5   :  { %s37_s10 = sshll.u32 %s609_s30, 4  ;;  %p446_p0 = scmp.ne.s32.totalorder %s810_s1, %s445_s13  ;;  %s38_s10 = int_to_ptr.vmem [resolvable:$true] %s37_s10 }
   0x6   :  { %p449_p1 = scmp.lt.u32.totalorder %s445_s13, %s810_s1 }
   0x8   :  { %p451_p2 = pnand %p449_p1, %p446_p0 }
   0xa   :  { %454 = shalt.err (!%p451_p2)
}
   0xb   :  { %s455_s18 = scalar_lea.vmem %s38_s10, 256  ;;  %p460_p4 = scmp.lt.s32.totalorder %s38_s10, %s38_s10 }
   0xc   :  { %p456_p3 = scmp.ne.s32.totalorder %s38_s10, %s455_s18  ;;  %p461_p5 = scmp.lt.s32.totalorder %s455_s18, %s455_s18 }
   0xe   :  { %p462_p6 = por %p461_p5, %p460_p4 }
  0x10   :  { %p463_p7 = pnand %p462_p6, %p456_p3 }
  0x12   :  { %466 = shalt.err (!%p463_p7)
}
  0x13   :  { %s610_s19 = smov 64   ;;  %s611_s20 = smov 4  }
  0x14   :  { %43 = dma.hbm_to_vmem [thread:$0]  %s810_s1, 256, %s38_s10, [#allocation6], %s610_s19, %s610_s19, %s611_s20  }
  0x15   :  { %s612_s23 = smov [#allocation2]   ;;  %s467_s27 = scalar_lea.hbm %s809_s0, 256 }
  0x16   :  { %s25_s24 = sshll.u32 %s612_s23, 4  ;;  %p468_p8 = scmp.ne.s32.totalorder %s809_s0, %s467_s27  ;;  %s26_s24 = int_to_ptr.vmem [resolvable:$true] %s25_s24 }
  0x17   :  { %p471_p9 = scmp.lt.u32.totalorder %s467_s27, %s809_s0 }
  0x19   :  { %p473_p10 = pnand %p471_p9, %p468_p8 }
  0x1b   :  { %476 = shalt.err (!%p473_p10)
}
  0x1c   :  { %s477_s12 = scalar_lea.vmem %s26_s24, 256  ;;  %p482_p12 = scmp.lt.s32.totalorder %s26_s24, %s26_s24 }
  0x1d   :  { %p478_p11 = scmp.ne.s32.totalorder %s26_s24, %s477_s12  ;;  %p483_p13 = scmp.lt.s32.totalorder %s477_s12, %s477_s12 }
  0x1f   :  { %p484_p0 = por %p483_p13, %p482_p12 }
  0x21   :  { %p485_p1 = pnand %p484_p0, %p478_p11 }
  0x23   :  { %488 = shalt.err (!%p485_p1)
}
  0x24   :  { %s613_s1 = smov 128   ;;  %s614_s10 = smov 8  }
  0x25   :  { %31 = dma.hbm_to_vmem [thread:$0]  %s809_s0, 256, %s26_s24, [#allocation3], %s613_s1, %s613_s1, %s614_s10  }
  0x26   :  { %s615_s15 = smov [#allocation7]   ;;  %s616_s17 = smov [#allocation8]  }
  0x27   :  { %s49_s16 = sshll.u32 %s615_s15, 4  ;;  %s61_s18 = sshll.u32 %s616_s17, 4  ;;  %s50_s16 = int_to_ptr.vmem [resolvable:$true] %s49_s16  ;;  %s699_s18 = int_to_ptr.vmem [resolvable:$true] %s61_s18 }
  0x28   :  { %s489_s23 = scalar_lea.hbm %s811_s2, 256 }
  0x29   :  { %p490_p2 = scmp.ne.s32.totalorder %s811_s2, %s489_s23  ;;  %p493_p3 = scmp.lt.u32.totalorder %s489_s23, %s811_s2 }
  0x2b   :  { %p495_p4 = pnand %p493_p3, %p490_p2 }
  0x2d   :  { %498 = shalt.err (!%p495_p4)
}
  0x2e   :  { %s499_s0 = scalar_lea.vmem %s50_s16, 256  ;;  %p504_p6 = scmp.lt.s32.totalorder %s50_s16, %s50_s16 }
  0x2f   :  { %p500_p5 = scmp.ne.s32.totalorder %s50_s16, %s499_s0  ;;  %p505_p7 = scmp.lt.s32.totalorder %s499_s0, %s499_s0 }
  0x31   :  { %p506_p8 = por %p505_p7, %p504_p6 }
  0x33   :  { %p507_p9 = pnand %p506_p8, %p500_p5 }
  0x35   :  { %510 = shalt.err (!%p507_p9)
}
  0x36   :  { %55 = dma.hbm_to_vmem [thread:$0]  %s811_s2, 256, %s50_s16, [#allocation6], %s610_s19, %s610_s19, %s611_s20  }
  0x37   :  { %s511_s12 = scalar_lea.hbm %s812_s3, 256 }
  0x38   :  { %p512_p10 = scmp.ne.s32.totalorder %s812_s3, %s511_s12  ;;  %p515_p11 = scmp.lt.u32.totalorder %s511_s12, %s812_s3 }
  0x3a   :  { %p517_p12 = pnand %p515_p11, %p512_p10 }
  0x3c   :  { %520 = shalt.err (!%p517_p12)
}
  0x3d   :  { %s521_s15 = scalar_lea.vmem %s699_s18, 256  ;;  %p526_p0 = scmp.lt.s32.totalorder %s699_s18, %s699_s18 }
  0x3e   :  { %p522_p13 = scmp.ne.s32.totalorder %s699_s18, %s521_s15  ;;  %p527_p1 = scmp.lt.s32.totalorder %s521_s15, %s521_s15 }
  0x40   :  { %p528_p2 = por %p527_p1, %p526_p0 }
  0x42   :  { %p529_p3 = pnand %p528_p2, %p522_p13 }
  0x44   :  { %532 = shalt.err (!%p529_p3)
}
  0x45   :  { %67 = dma.hbm_to_vmem [thread:$0]  %s812_s3, 256, %s699_s18, [#allocation9], %s610_s19, %s610_s19, %s611_s20  }
  0x46   :  { %599 = dma.done.wait [#allocation3], 256  }
  0x47   :  { %600 = vsyncadd [#allocation3], 4294967040 }
  0x48   :  { %601 = dma.done.wait [#allocation6], 512  }
  0x49   :  { %602 = vsyncadd [#allocation6], 4294966784 }
  0x4a   :  { %603 = dma.done.wait [#allocation9], 256  }
  0x4b   :  { %604 = vsyncadd [#allocation9], 4294967040  ;;  %v617_v0 = vmov 0.0   ;;  %vm618_vm0 = vmmov 0   ;;  %v439_v1 = vld [vmem:[#allocation5] sm:$0xff]   ;;  %v440_v2 = vld [vmem:[#allocation5 + $0x8] sm:$0xff]  }
  0x4c   :  { %402 = vmatprep.subr.bf16.mxu0 %v617_v0  ;;  %410 = vmatprep.subr.bf16.mxu1 %v617_v0  ;;  %v441_v3 = vld [vmem:[#allocation7] sm:$0xff]   ;;  %v88_v5 = vld [vmem:[#allocation2 + $0x8] sm:$0xff]  ;;  %vm113_vm1 = vcmask 261120   ;;  %v442_v8 = vld [vmem:[#allocation8] sm:$0xff]   ;;  %vm168_vm2 = vcmask 257024   ;;  %s619_s22 = smov [#allocation11]  }
  0x4d   :  { %406 = vmatprep.mubr.msk.bf16.mxu0 %vm618_vm0, %v617_v0  ;;  %414 = vmatprep.mubr.msk.bf16.mxu1 %vm618_vm0, %v617_v0  ;;  %v87_v4 = vld [vmem:[#allocation2] sm:$0xff]  ;;  %v443_v7 = vld [vmem:[#allocation7 + $0x8] sm:$0xff]   ;;  %v444_v9 = vld [vmem:[#allocation8 + $0x8] sm:$0xff]   ;;  %s336_s23 = sshll.u32 %s619_s22, 4  ;;  %s621_s27 = smov [#allocation13]   ;;  %s337_s23 = int_to_ptr.vmem [resolvable:$true] %s336_s23 }
  0x4e   :  { %403 = vmatpush3.bf16.msra.mxu0 %v439_v1  ;;  %411 = vmatpush3.bf16.msra.mxu1 %v441_v3  ;;  %v89_v6 = vpack.c.bf16 %v88_v5, %v87_v4  ;;  %v369_v10 = vld [vmem:[%s813_s4] ss:$0 sm:$0xff]  ;;  %s620_s4 = smov [#allocation10]   ;;  %s754_s28 = sshll.u32 %s621_s27, 4  ;;  %s349_s28 = int_to_ptr.vmem [resolvable:$true] %s754_s28 }
  0x4f   :  { %404 = vmatprep.subr.bf16.mxu0 %v617_v0  ;;  %412 = vmatprep.subr.bf16.mxu1 %v617_v0  ;;  %v375_v12 = vld [vmem:[%s814_s5] ss:$0 sm:$0xff]  ;;  %s324_s5 = sshll.u32 %s620_s4, 4  ;;  %p538_p5 = scmp.lt.s32.totalorder %s337_s23, %s337_s23  ;;  %s750_s5 = int_to_ptr.vmem [resolvable:$true] %s324_s5 }
  0x50   :  { %v381_v28 = vld [vmem:[%s815_s6] ss:$0 sm:$0xff]  ;;  %s533_s6 = scalar_lea.vmem %s337_s23, 128 }
  0x51   :  { %p534_p4 = scmp.ne.s32.totalorder %s337_s23, %s533_s6  ;;  %p539_p6 = scmp.lt.s32.totalorder %s533_s6, %s533_s6 }
  0x52   :  { %405 = vmatpush3.bf16.msra.mxu0 %v440_v2  ;;  %413 = vmatpush3.bf16.msra.mxu1 %v443_v7 }
  0x53   :  { %418 = vmatprep.subr.bf16.mxu0 %v617_v0  ;;  %p540_p7 = por %p539_p6, %p538_p5 }
  0x55   :  { %407 = vmatmul.mubr.msk.bf16.vlgmr.msra.gmra.mrb[0].mxu0 %vm113_vm1, %v89_v6  ;;  %415 = vmatmul.mubr.msk.bf16.vlgmr.msra.gmra.mrb[0].mxu1 %vm113_vm1, %v89_v6  ;;  %p541_p8 = pnand %p540_p7, %p534_p4 }
  0x56   :  { %419 = vmatpush3.bf16.msra.mxu0 %v442_v8  ;;  %422 = vmatprep.mubr.msk.bf16.mxu0 %vm618_vm0, %v617_v0 }
  0x57   :  { %420 = vmatprep.subr.bf16.mxu0 %v617_v0 }
  0x5a   :  { %421 = vmatpush3.bf16.msra.mxu0 %v444_v9 }
  0x5d   :  { %423 = vmatmul.mubr.msk.bf16.vlgmr.msra.gmra.mrb[4].mxu0 %vm113_vm1, %v89_v6 }
 0x128   :  { %v151_v11 = vpop.f32.mrb[0].mxu0  ;;  %v228_v16 = vpop.f32.mrb[0].mxu1 }
 0x129   :  { %v152_v13 = vadd.f32 %v369_v10, %v151_v11  ;;  %v408_v14 = vpop.f32.mrb[1].mxu0  ;;  %v229_v20 = vadd.f32 %v375_v12, %v228_v16  ;;  %v416_v21 = vpop.f32.mrb[1].mxu1 }
 0x12a   :  { %v154_v15 = vpop.f32.mrb[2].mxu0  ;;  %v231_v22 = vpop.f32.mrb[2].mxu1 }
 0x12b   :  { %v158_v17 = vmul.f32 0.35355338, %v152_v13  ;;  %v155_v18 = vadd.f32 %v369_v10, %v154_v15  ;;  %v409_v19 = vpop.f32.mrb[3].mxu0  ;;  %v389_v25 = vpack.c.bf16 %v229_v20, %v229_v20  ;;  %v232_v26 = vadd.f32 %v375_v12, %v231_v22  ;;  %v417_v27 = vpop.f32.mrb[3].mxu1 }
 0x12d   :  { %v387_v23 = vpack.c.bf16 %v158_v17, %v158_v17  ;;  %v159_v24 = vmul.f32 0.35355338, %v155_v18  ;;  %v390_v30 = vpack.c.bf16 %v232_v26, %v232_v26  ;;  %243 = vst.msk [vmem:[#allocation11] sm:$0xf] %vm168_vm2, %v389_v25 }
 0x12f   :  { %v388_v29 = vpack.c.bf16 %v159_v24, %v159_v24  ;;  %169 = vst.msk [vmem:[#allocation10] sm:$0xf] %vm168_vm2, %v387_v23  ;;  %244 = vst.msk [vmem:[#allocation11 + $0x4] sm:$0xf] %vm168_vm2, %v390_v30 }
 0x130   :  { %v302_v31 = vpop.f32.mrb[4].mxu0 }
 0x131   :  { %v303_v32 = vadd.f32 %v381_v28, %v302_v31  ;;  %170 = vst.msk [vmem:[#allocation10 + $0x4] sm:$0xf] %vm168_vm2, %v388_v29  ;;  %v424_v33 = vpop.f32.mrb[5].mxu0 }
 0x132   :  { %v305_v34 = vpop.f32.mrb[6].mxu0 }
 0x133   :  { %544 = shalt.err (!%p541_p8)
}
 0x134   :  { %s545_s29 = scalar_lea.hbm %s817_s8, 128 }
 0x135   :  { %p546_p9 = scmp.ne.s32.totalorder %s817_s8, %s545_s29  ;;  %p549_p10 = scmp.lt.u32.totalorder %s545_s29, %s817_s8 }
 0x137   :  { %p551_p11 = pnand %p549_p10, %p546_p9 }
 0x139   :  { %554 = shalt.err (!%p551_p11)
}
 0x13a   :  { %342 = dma.vmem_to_hbm [thread:$0]  %s337_s23, 128, %s817_s8, [#allocation12], %s610_s19, %s610_s19, %s611_s20   ;;  %v391_v35 = vpack.c.bf16 %v303_v32, %v303_v32  ;;  %v306_v36 = vadd.f32 %v381_v28, %v305_v34  ;;  %v425_v37 = vpop.f32.mrb[7].mxu0 }
 0x13b   :  { %s555_s14 = scalar_lea.vmem %s750_s5, 128  ;;  %p560_p13 = scmp.lt.s32.totalorder %s750_s5, %s750_s5 }
 0x13c   :  { %p556_p12 = scmp.ne.s32.totalorder %s750_s5, %s555_s14  ;;  %p561_p0 = scmp.lt.s32.totalorder %s555_s14, %s555_s14 }
 0x13e   :  { %p562_p1 = por %p561_p0, %p560_p13 }
 0x140   :  { %p563_p2 = pnand %p562_p1, %p556_p12 }
 0x142   :  { %566 = shalt.err (!%p563_p2)
}
 0x143   :  { %s567_s16 = scalar_lea.hbm %s816_s7, 128 }
 0x144   :  { %p568_p3 = scmp.ne.s32.totalorder %s816_s7, %s567_s16  ;;  %p571_p4 = scmp.lt.u32.totalorder %s567_s16, %s816_s7 }
 0x146   :  { %p573_p5 = pnand %p571_p4, %p568_p3 }
 0x148   :  { %576 = shalt.err (!%p573_p5)
}
 0x149   :  { %330 = dma.vmem_to_hbm [thread:$0]  %s750_s5, 128, %s816_s7, [#allocation4], %s610_s19, %s610_s19, %s611_s20   ;;  %317 = vst.msk [vmem:[#allocation13] sm:$0xf] %vm168_vm2, %v391_v35  ;;  %v392_v38 = vpack.c.bf16 %v306_v36, %v306_v36 }
 0x14a   :  { %s577_s23 = scalar_lea.vmem %s349_s28, 128  ;;  %p582_p7 = scmp.lt.s32.totalorder %s349_s28, %s349_s28 }
 0x14b   :  { %318 = vst.msk [vmem:[#allocation13 + $0x4] sm:$0xf] %vm168_vm2, %v392_v38  ;;  %p578_p6 = scmp.ne.s32.totalorder %s349_s28, %s577_s23  ;;  %p583_p8 = scmp.lt.s32.totalorder %s577_s23, %s577_s23 }
 0x14d   :  { %p584_p9 = por %p583_p8, %p582_p7 }
 0x14f   :  { %p585_p10 = pnand %p584_p9, %p578_p6 }
 0x151   :  { %588 = shalt.err (!%p585_p10)
}
 0x152   :  { %s589_s26 = scalar_lea.hbm %s818_s9, 128 }
 0x153   :  { %p590_p11 = scmp.ne.s32.totalorder %s818_s9, %s589_s26  ;;  %p593_p12 = scmp.lt.u32.totalorder %s589_s26, %s818_s9 }
 0x155   :  { %p595_p13 = pnand %p593_p12, %p590_p11 }
 0x157   :  { %598 = shalt.err (!%p595_p13)
}
 0x158   :  { %354 = dma.vmem_to_hbm [thread:$0]  %s349_s28, 128, %s818_s9, [#allocation12], %s610_s19, %s610_s19, %s611_s20  }
 0x159   :  { %605 = dma.done.wait [#allocation4], 128  }
 0x15a   :  { %606 = vsyncadd [#allocation4], 4294967168 }
 0x15b   :  { %607 = dma.done.wait [#allocation12], 256  }
 0x15c   :  { %608 = vsyncadd [#allocation12], 4294967040 }
 0x15d   :  { %364 = vsyncpa [#allocation3], 1 }
 0x15e   :  { %365 = vsyncpa [#allocation6], 1 }
 0x15f   :  { %366 = vsyncpa [#allocation9], 1 }
 0x160   :  { %367 = vsyncpa [#allocation4], 1 }
 0x161   :  { %368 = vsyncpa [#allocation12], 1 }

</bundles_post_ra>
